<compile_context>
chip_gen: v7x
topology: tpu7x:2x2x1
jax: 0.10.0
libtpu: 0.0.40
codegen_flags: <defaults>
</compile_context>

<pallas_src>
import math
import functools

import jax
import jax.numpy as jnp
from jax.experimental import pallas as pl
from jax.experimental.pallas import tpu as pltpu


def _layernorm(x, gamma, beta, eps=1e-5):
    # PyTorch nn.LayerNorm: normalize over last dim, biased variance, eps=1e-5.
    mean = jnp.mean(x, axis=-1, keepdims=True)
    var = jnp.mean((x - mean) ** 2, axis=-1, keepdims=True)
    inv = jax.lax.rsqrt(var + eps)
    return (x - mean) * inv * gamma + beta


def encoder_layer_kernel(
    x_ref, bias_ref,
    wqkv_ref, bqkv_ref, wo_ref, bo_ref,
    g1_ref, be1_ref, w1_ref, b1_ref, w2_ref, b2_ref, g2_ref, be2_ref,
    out_ref,
    *, num_heads, d_k, d_v, block_b, seq_len, d_inner_block,
):
    H, S, Bt = num_heads, seq_len, block_b
    f32, bf16 = jnp.float32, jnp.bfloat16
    hk, hv = H * d_k, H * d_v

    x = x_ref[...]                                   # (N, D) f32, N = Bt*S
    N, D = x.shape
    x_bf = x.astype(bf16)

    # ---- Fused QKV projection: one lane-dense MXU matmul (scale folded in wrapper) ----
    qkv = jnp.dot(x_bf, wqkv_ref[...], preferred_element_type=f32) + bqkv_ref[...]
    q = qkv[:, :hk].reshape(Bt, S, hk)               # leading-dim reshapes only
    k = qkv[:, hk:2 * hk].reshape(Bt, S, hk)
    v = qkv[:, 2 * hk:2 * hk + hv].reshape(Bt, S, hv)

    # Additive attention bias, precomputed in the wrapper (bf16), used for every head.
    bias = bias_ref[...].astype(f32)                 # (Bt, S, S)

    # ---- Attention, batched over the whole block (no per-sequence loop). ----
    # Heads are a tiny static loop over lane slices; the score/PV matmuls are
    # structurally <7% MXU-efficient at d_k=8 regardless of layout, so no extra
    # tiling complexity here (per review).  Output stays in registers.
    o_parts = []
    for h in range(H):
        qs = q[:, :, h * d_k:(h + 1) * d_k].astype(bf16)   # (Bt, S, d_k)
        ks = k[:, :, h * d_k:(h + 1) * d_k].astype(bf16)
        vs = v[:, :, h * d_v:(h + 1) * d_v].astype(bf16)
        s = jnp.einsum("bqd,bkd->bqk", qs, ks,
                       preferred_element_type=f32)          # (Bt, S, S) f32
        s = s + bias
        s = s - jnp.max(s, axis=-1, keepdims=True)
        p = jnp.exp(s)
        p = p * pl.reciprocal(jnp.sum(p, axis=-1, keepdims=True), approx=True)
        o_parts.append(jnp.einsum("bqk,bkd->bqd", p.astype(bf16), vs,
                                  preferred_element_type=f32))  # (Bt, S, d_v)

    # Heads folded back into lanes -> lane-dense (N, H*d_v) bf16, no VMEM scratch.
    o_bf = jnp.concatenate(o_parts, axis=-1).reshape(N, hv).astype(bf16)

    # ---- Output projection: single lane-dense matmul (replaces per-head proj + reduce) ----
    attn = jnp.dot(o_bf, wo_ref[...], preferred_element_type=f32) + bo_ref[...]

    # ---- Residual + LayerNorm 1 (f32 vector math) ----
    n1 = _layernorm(x + attn, g1_ref[...], be1_ref[...])
    n1_bf = n1.astype(bf16)

    # ---- FFN: Linear -> ReLU -> Linear, tiled along d_inner ----
    # Chunking bounds the (N, d_inner_block) working set for production shapes
    # (v7x 64 MiB VMEM); at the test shapes this is a single chunk.
    d_inner = w1_ref.shape[1]
    ck = d_inner_block
    ffn = jnp.zeros((N, D), f32)
    for c in range(d_inner // ck):
        lo, hi = c * ck, (c + 1) * ck
        hblk = jnp.dot(n1_bf, w1_ref[:, lo:hi],
                       preferred_element_type=f32) + b1_ref[:, lo:hi]
        hblk = jnp.maximum(hblk, 0.0).astype(bf16)
        ffn = ffn + jnp.dot(hblk, w2_ref[lo:hi, :], preferred_element_type=f32)
    ffn = ffn + b2_ref[...]

    # ---- Residual + LayerNorm 2 ----
    out_ref[...] = _layernorm(n1 + ffn, g2_ref[...], be2_ref[...]).astype(out_ref.dtype)


def prepare_params(params, *, num_heads, d_k, d_v):
    """One-time weight repack (hoisted out of the per-call path, per review)."""
    bf16, f32 = jnp.bfloat16, jnp.float32
    scale = jnp.float32(1.0 / math.sqrt(d_k))
    # Fused QKV weight, with the 1/sqrt(d_k) scale folded into Wq / bq.
    wqkv = jnp.concatenate([params["wq"] * scale, params["wk"], params["wv"]],
                           axis=1).astype(bf16)                       # (D, 2*H*d_k + H*d_v)
    bqkv = jnp.concatenate([params["bq"] * scale, params["bk"], params["bv"]],
                           axis=1).astype(f32)                        # (1, ...)
    return {
        "wqkv": wqkv, "bqkv": bqkv,
        "wo": params["wo"].astype(bf16), "bo": params["bo"].astype(f32),
        "g1": params["g1"].astype(f32), "be1": params["be1"].astype(f32),
        "w1": params["w1"].astype(bf16), "b1": params["b1"].astype(f32),
        "w2": params["w2"].astype(bf16), "b2": params["b2"].astype(f32),
        "g2": params["g2"].astype(f32), "be2": params["be2"].astype(f32),
    }


def _vmem_limit_bytes(n_rows, d_model, block_b, seq_len, d_inner_block, weights):
    # Activations: x + out (f32, double-buffered) + additive bias (bf16, double-buffered).
    act = 2 * (2 * n_rows * d_model * 4) + 2 * (block_b * seq_len * seq_len * 2)
    # Grid-invariant weights: constant index_map -> fetched once (counted 1x, per review).
    wgt = sum(int(w.size) * w.dtype.itemsize for w in weights)
    # FFN chunk working set (h1 chunk f32 + bf16 copy).
    ffn = n_rows * d_inner_block * 6
    # Generation-aware cap: ~80% of physical VMEM (v5e/v6e 128 MiB -> ~102 MiB,
    # v7x 64 MiB -> ~51 MiB) instead of a hard 64 MiB clamp.
    try:
        cap = int(pltpu.get_tpu_info().vmem_capacity_bytes)
    except Exception:  # pragma: no cover - conservative fallback
        cap = 64 << 20
    cap = max(int(cap * 0.8), 32 << 20)
    return int(min(max(act + wgt + ffn + (8 << 20), 16 << 20), cap))


def encoder_layer(x, mask, prepped, *, num_heads, d_k, d_v, block_b=1,
                  d_inner_block=None):
    B, S, D = x.shape
    assert B % block_b == 0, "block_b must divide batch"
    # Keep grid >= 2 when possible so both v7x TensorCores get grid points.
    H = num_heads
    N = block_b * S
    d_inner = prepped["w1"].shape[1]
    if d_inner_block is None:
        d_inner_block = min(d_inner, 1024)
    if d_inner % d_inner_block != 0:
        d_inner_block = d_inner

    # Precomputed additive attention bias in bf16 (2x less DMA than the f32 mask;
    # compare hoisted out of the kernel).  mask: 1.0 = attend, 0.0 = masked.
    bias = jnp.where(mask > 0.0, jnp.float32(0.0), jnp.float32(-1e9)).astype(jnp.bfloat16)

    # Lane-dense activation slab: fold (B, S) into the matmul M dimension.
    x2 = x.reshape(B * S, D)

    weights = [prepped[k] for k in
               ("wqkv", "bqkv", "wo", "bo", "g1", "be1",
                "w1", "b1", "w2", "b2", "g2", "be2")]

    # Grid-invariant weights: constant index_map -> the block is only fetched on the
    # first grid step.  (pipeline_mode=pl.Buffered(1) would make single-buffering
    # explicit; omitted here to keep the lowering on the well-trodden path.)
    def rep(arr):
        nd = arr.ndim
        return pl.BlockSpec(arr.shape, lambda b, nd=nd: (0,) * nd)

    in_specs = [pl.BlockSpec((N, D), lambda b: (b, 0)),               # x slab block
                pl.BlockSpec((block_b, S, S), lambda b: (b, 0, 0))]   # additive bias block
    in_specs += [rep(w) for w in weights]

    vmem_limit = _vmem_limit_bytes(N, D, block_b, S, d_inner_block, weights)

    kernel = functools.partial(encoder_layer_kernel, num_heads=H, d_k=d_k, d_v=d_v,
                               block_b=block_b, seq_len=S, d_inner_block=d_inner_block)

    out2 = pl.pallas_call(
        kernel,
        out_shape=jax.ShapeDtypeStruct((B * S, D), jnp.float32),
        grid_spec=pltpu.PrefetchScalarGridSpec(
            num_scalar_prefetch=0,
            grid=(B // block_b,),
            in_specs=in_specs,
            out_specs=pl.BlockSpec((N, D), lambda b: (b, 0)),
        ),
        compiler_params=pltpu.CompilerParams(
            dimension_semantics=("parallel",),
            vmem_limit_bytes=vmem_limit),
    )(x2, bias, *weights)

    return out2.reshape(B, S, D)


def reference_encoder_layer(x, mask, params, *, num_heads, d_k, d_v):
    """Pure-JAX f32 reference for correctness checking."""
    B, S, D = x.shape
    q = x @ params["wq"] + params["bq"]
    k = x @ params["wk"] + params["bk"]
    v = x @ params["wv"] + params["bv"]
    q = q.reshape(B, S, num_heads, d_k).transpose(0, 2, 1, 3)
    k = k.reshape(B, S, num_heads, d_k).transpose(0, 2, 1, 3)
    v = v.reshape(B, S, num_heads, d_v).transpose(0, 2, 1, 3)
    scores = jnp.einsum("bhqd,bhkd->bhqk", q, k) / math.sqrt(d_k)
    scores = jnp.where(mask[:, None, :, :] > 0.0, scores, -1e9)
    p = jax.nn.softmax(scores, axis=-1)
    o = jnp.einsum("bhqk,bhkd->bhqd", p, v).transpose(0, 2, 1, 3).reshape(B, S, num_heads * d_v)
    attn_out = o @ params["wo"] + params["bo"]

    def ln(y, g, b):
        m = y.mean(-1, keepdims=True)
        var = ((y - m) ** 2).mean(-1, keepdims=True)
        return (y - m) / jnp.sqrt(var + 1e-5) * g + b

    n1 = ln(x + attn_out, params["g1"], params["be1"])
    h1 = jnp.maximum(n1 @ params["w1"] + params["b1"], 0.0)
    ffn = h1 @ params["w2"] + params["b2"]
    return ln(n1 + ffn, params["g2"], params["be2"])


def init_params(key, d_model, num_heads, d_k, d_v, d_inner):
    ks = jax.random.split(key, 8)
    s = 0.05
    return {
        "wq": s * jax.random.normal(ks[0], (d_model, num_heads * d_k), jnp.float32),
        "bq": jnp.zeros((1, num_heads * d_k), jnp.float32),
        "wk": s * jax.random.normal(ks[1], (d_model, num_heads * d_k), jnp.float32),
        "bk": jnp.zeros((1, num_heads * d_k), jnp.float32),
        "wv": s * jax.random.normal(ks[2], (d_model, num_heads * d_v), jnp.float32),
        "bv": jnp.zeros((1, num_heads * d_v), jnp.float32),
        "wo": s * jax.random.normal(ks[3], (num_heads * d_v, d_model), jnp.float32),
        "bo": jnp.zeros((1, d_model), jnp.float32),
        "g1": jnp.ones((1, d_model), jnp.float32),
        "be1": jnp.zeros((1, d_model), jnp.float32),
        "w1": s * jax.random.normal(ks[4], (d_model, d_inner), jnp.float32),
        "b1": jnp.zeros((1, d_inner), jnp.float32),
        "w2": s * jax.random.normal(ks[5], (d_inner, d_model), jnp.float32),
        "b2": jnp.zeros((1, d_model), jnp.float32),
        "g2": jnp.ones((1, d_model), jnp.float32),
        "be2": jnp.zeros((1, d_model), jnp.float32),
    }


if __name__ == "__main__":
    # Small shapes consistent with the module's forward:
    B, S = 2, 8
    d_model, num_heads, d_k, d_v, d_inner = 32, 4, 8, 8, 64

    key = jax.random.PRNGKey(0)
    kx, kp = jax.random.split(key)
    x = jax.random.normal(kx, (B, S, d_model), jnp.float32)

    # mask: 1.0 = attend, 0.0 = masked (causal mask as example)
    mask = jnp.tril(jnp.ones((S, S), jnp.float32))[None].repeat(B, axis=0)

    params = init_params(kp, d_model, num_heads, d_k, d_v, d_inner)
    ref = reference_encoder_layer(x, mask, params, num_heads=num_heads, d_k=d_k, d_v=d_v)

    # One-time weight repack + jitted wrapper (weights are not re-cast per call).
    prepped = prepare_params(params, num_heads=num_heads, d_k=d_k, d_v=d_v)
    # block_b=1 -> grid of B=2 blocks, keeping both v7x TensorCores busy.
    run = jax.jit(functools.partial(encoder_layer, num_heads=num_heads, d_k=d_k,
                                    d_v=d_v, block_b=1))

    out = jax.block_until_ready(run(x, mask, prepped))
    assert out.shape == (B, S, d_model)
    # Tolerance loosened vs. pure-f32 because matmul operands are bf16 + approx recip.
    assert jnp.allclose(out, ref, rtol=5e-2, atol=5e-2), "mismatch vs. JAX reference"

    print("KERNEL_OK")
</pallas_src>

<mosaic_0001>
module attributes {stable_mosaic.version = 11 : i64} {
  func.func @encoder_layer_kernel(%arg0: i32, %arg1: memref<8x32xf32, #tpu.memory_space<vmem>>, %arg2: memref<1x8x8xbf16, #tpu.memory_space<vmem>>, %arg3: memref<32x96xbf16, #tpu.memory_space<vmem>>, %arg4: memref<1x96xf32, #tpu.memory_space<vmem>>, %arg5: memref<32x32xbf16, #tpu.memory_space<vmem>>, %arg6: memref<1x32xf32, #tpu.memory_space<vmem>>, %arg7: memref<1x32xf32, #tpu.memory_space<vmem>>, %arg8: memref<1x32xf32, #tpu.memory_space<vmem>>, %arg9: memref<32x64xbf16, #tpu.memory_space<vmem>>, %arg10: memref<1x64xf32, #tpu.memory_space<vmem>>, %arg11: memref<64x32xbf16, #tpu.memory_space<vmem>>, %arg12: memref<1x32xf32, #tpu.memory_space<vmem>>, %arg13: memref<1x32xf32, #tpu.memory_space<vmem>>, %arg14: memref<1x32xf32, #tpu.memory_space<vmem>>, %arg15: memref<8x32xf32, #tpu.memory_space<vmem>>) attributes {dimension_semantics = [#tpu.dimension_semantics<parallel>], iteration_bounds = array<i64: 2>, scalar_prefetch = 0 : i64, scratch_operands = 0 : i64, tpu.core_type = #tpu.core_type<tc>, window_params = [{transform_indices = @transform_0, window_bounds = array<i64: 8, 32>}, {transform_indices = @transform_1, window_bounds = array<i64: 1, 8, 8>}, {pipeline_mode = #tpu.pipeline_mode<synchronous>, transform_indices = @transform_2, window_bounds = array<i64: 32, 96>}, {pipeline_mode = #tpu.pipeline_mode<synchronous>, transform_indices = @transform_3, window_bounds = array<i64: 1, 96>}, {pipeline_mode = #tpu.pipeline_mode<synchronous>, transform_indices = @transform_4, window_bounds = array<i64: 32, 32>}, {pipeline_mode = #tpu.pipeline_mode<synchronous>, transform_indices = @transform_5, window_bounds = array<i64: 1, 32>}, {pipeline_mode = #tpu.pipeline_mode<synchronous>, transform_indices = @transform_6, window_bounds = array<i64: 1, 32>}, {pipeline_mode = #tpu.pipeline_mode<synchronous>, transform_indices = @transform_7, window_bounds = array<i64: 1, 32>}, {pipeline_mode = #tpu.pipeline_mode<synchronous>, transform_indices = @transform_8, window_bounds = array<i64: 32, 64>}, {pipeline_mode = #tpu.pipeline_mode<synchronous>, transform_indices = @transform_9, window_bounds = array<i64: 1, 64>}, {pipeline_mode = #tpu.pipeline_mode<synchronous>, transform_indices = @transform_10, window_bounds = array<i64: 64, 32>}, {pipeline_mode = #tpu.pipeline_mode<synchronous>, transform_indices = @transform_11, window_bounds = array<i64: 1, 32>}, {pipeline_mode = #tpu.pipeline_mode<synchronous>, transform_indices = @transform_12, window_bounds = array<i64: 1, 32>}, {pipeline_mode = #tpu.pipeline_mode<synchronous>, transform_indices = @transform_13, window_bounds = array<i64: 1, 32>}, {transform_indices = @transform_14, window_bounds = array<i64: 8, 32>}]} {
    %c0 = arith.constant 0 : index
    %c0_0 = arith.constant 0 : index
    %0 = vector.load %arg1[%c0, %c0_0] : memref<8x32xf32, #tpu.memory_space<vmem>>, vector<8x32xf32>
    %1 = arith.truncf %0 : vector<8x32xf32> to vector<8x32xbf16>
    %c0_1 = arith.constant 0 : index
    %c0_2 = arith.constant 0 : index
    %2 = vector.load %arg3[%c0_1, %c0_2] : memref<32x96xbf16, #tpu.memory_space<vmem>>, vector<32x96xbf16>
    %cst = arith.constant dense<0.000000e+00> : vector<8x96xf32>
    %3 = tpu.matmul %1, %2, %cst {dimension_numbers = #tpu.dot_dimension_numbers<[1], [0], [0], [1], [0, 0, 1, 1], [], []>} : vector<8x32xbf16>, vector<32x96xbf16>, vector<8x96xf32> -> vector<8x96xf32>
    %c0_3 = arith.constant 0 : index
    %c0_4 = arith.constant 0 : index
    %4 = vector.load %arg4[%c0_3, %c0_4] : memref<1x96xf32, #tpu.memory_space<vmem>>, vector<1x96xf32>
    %5 = vector.broadcast %4 : vector<1x96xf32> to vector<8x96xf32>
    %6 = arith.addf %3, %5 : vector<8x96xf32>
    %7 = vector.extract_strided_slice %6 {offsets = [0, 0], sizes = [8, 32], strides = [1, 1]} : vector<8x96xf32> to vector<8x32xf32>
    %8 = vector.shape_cast %7 : vector<8x32xf32> to vector<1x8x32xf32>
    %9 = vector.extract_strided_slice %6 {offsets = [0, 32], sizes = [8, 32], strides = [1, 1]} : vector<8x96xf32> to vector<8x32xf32>
    %10 = vector.shape_cast %9 : vector<8x32xf32> to vector<1x8x32xf32>
    %11 = vector.extract_strided_slice %6 {offsets = [0, 64], sizes = [8, 32], strides = [1, 1]} : vector<8x96xf32> to vector<8x32xf32>
    %12 = vector.shape_cast %11 : vector<8x32xf32> to vector<1x8x32xf32>
    %c0_5 = arith.constant 0 : index
    %c0_6 = arith.constant 0 : index
    %c0_7 = arith.constant 0 : index
    %13 = vector.load %arg2[%c0_5, %c0_6, %c0_7] : memref<1x8x8xbf16, #tpu.memory_space<vmem>>, vector<1x8x8xbf16>
    %14 = arith.extf %13 : vector<1x8x8xbf16> to vector<1x8x8xf32>
    %15 = vector.extract_strided_slice %8 {offsets = [0, 0, 0], sizes = [1, 8, 8], strides = [1, 1, 1]} : vector<1x8x32xf32> to vector<1x8x8xf32>
    %16 = arith.truncf %15 : vector<1x8x8xf32> to vector<1x8x8xbf16>
    %17 = vector.extract_strided_slice %10 {offsets = [0, 0, 0], sizes = [1, 8, 8], strides = [1, 1, 1]} : vector<1x8x32xf32> to vector<1x8x8xf32>
    %18 = arith.truncf %17 : vector<1x8x8xf32> to vector<1x8x8xbf16>
    %19 = vector.extract_strided_slice %12 {offsets = [0, 0, 0], sizes = [1, 8, 8], strides = [1, 1, 1]} : vector<1x8x32xf32> to vector<1x8x8xf32>
    %20 = arith.truncf %19 : vector<1x8x8xf32> to vector<1x8x8xbf16>
    "tpu.trace_start"() <{level = 10 : i32, message = "bqd,bkd->bqk"}> : () -> ()
    %cst_8 = arith.constant dense<0.000000e+00> : vector<1x8x8xf32>
    %21 = tpu.matmul %16, %18, %cst_8 {dimension_numbers = #tpu.dot_dimension_numbers<[2], [2], [1], [1], [0, 0, 0, 1, 1, 1], [0], [0]>} : vector<1x8x8xbf16>, vector<1x8x8xbf16>, vector<1x8x8xf32> -> vector<1x8x8xf32>
    "tpu.trace_stop"() : () -> ()
    %22 = arith.addf %21, %14 : vector<1x8x8xf32>
    %cst_9 = arith.constant dense<0xFF800000> : vector<1x8xf32>
    %23 = vector.multi_reduction <maximumf>, %22, %cst_9 [2] : vector<1x8x8xf32> to vector<1x8xf32>
    %24 = vector.shape_cast %23 : vector<1x8xf32> to vector<1x8x1xf32>
    %25 = vector.broadcast %24 : vector<1x8x1xf32> to vector<1x8x8xf32>
    %26 = arith.subf %22, %25 : vector<1x8x8xf32>
    %27 = math.exp %26 : vector<1x8x8xf32>
    %cst_10 = arith.constant dense<0.000000e+00> : vector<1x8xf32>
    %28 = vector.multi_reduction <add>, %27, %cst_10 [2] : vector<1x8x8xf32> to vector<1x8xf32>
    %29 = vector.shape_cast %28 : vector<1x8xf32> to vector<1x8x1xf32>
    %30 = tpu.reciprocal %29 {approx = true} : vector<1x8x1xf32> -> vector<1x8x1xf32>
    %31 = vector.broadcast %30 : vector<1x8x1xf32> to vector<1x8x8xf32>
    %32 = arith.mulf %27, %31 : vector<1x8x8xf32>
    %33 = arith.truncf %32 : vector<1x8x8xf32> to vector<1x8x8xbf16>
    "tpu.trace_start"() <{level = 10 : i32, message = "bqk,bkd->bqd"}> : () -> ()
    %cst_11 = arith.constant dense<0.000000e+00> : vector<1x8x8xf32>
    %34 = tpu.matmul %33, %20, %cst_11 {dimension_numbers = #tpu.dot_dimension_numbers<[2], [1], [1], [2], [0, 0, 0, 1, 1, 2], [0], [0]>} : vector<1x8x8xbf16>, vector<1x8x8xbf16>, vector<1x8x8xf32> -> vector<1x8x8xf32>
    "tpu.trace_stop"() : () -> ()
    %35 = vector.extract_strided_slice %8 {offsets = [0, 0, 8], sizes = [1, 8, 8], strides = [1, 1, 1]} : vector<1x8x32xf32> to vector<1x8x8xf32>
    %36 = arith.truncf %35 : vector<1x8x8xf32> to vector<1x8x8xbf16>
    %37 = vector.extract_strided_slice %10 {offsets = [0, 0, 8], sizes = [1, 8, 8], strides = [1, 1, 1]} : vector<1x8x32xf32> to vector<1x8x8xf32>
    %38 = arith.truncf %37 : vector<1x8x8xf32> to vector<1x8x8xbf16>
    %39 = vector.extract_strided_slice %12 {offsets = [0, 0, 8], sizes = [1, 8, 8], strides = [1, 1, 1]} : vector<1x8x32xf32> to vector<1x8x8xf32>
    %40 = arith.truncf %39 : vector<1x8x8xf32> to vector<1x8x8xbf16>
    "tpu.trace_start"() <{level = 10 : i32, message = "bqd,bkd->bqk"}> : () -> ()
    %cst_12 = arith.constant dense<0.000000e+00> : vector<1x8x8xf32>
    %41 = tpu.matmul %36, %38, %cst_12 {dimension_numbers = #tpu.dot_dimension_numbers<[2], [2], [1], [1], [0, 0, 0, 1, 1, 1], [0], [0]>} : vector<1x8x8xbf16>, vector<1x8x8xbf16>, vector<1x8x8xf32> -> vector<1x8x8xf32>
    "tpu.trace_stop"() : () -> ()
    %42 = arith.addf %41, %14 : vector<1x8x8xf32>
    %cst_13 = arith.constant dense<0xFF800000> : vector<1x8xf32>
    %43 = vector.multi_reduction <maximumf>, %42, %cst_13 [2] : vector<1x8x8xf32> to vector<1x8xf32>
    %44 = vector.shape_cast %43 : vector<1x8xf32> to vector<1x8x1xf32>
    %45 = vector.broadcast %44 : vector<1x8x1xf32> to vector<1x8x8xf32>
    %46 = arith.subf %42, %45 : vector<1x8x8xf32>
    %47 = math.exp %46 : vector<1x8x8xf32>
    %cst_14 = arith.constant dense<0.000000e+00> : vector<1x8xf32>
    %48 = vector.multi_reduction <add>, %47, %cst_14 [2] : vector<1x8x8xf32> to vector<1x8xf32>
    %49 = vector.shape_cast %48 : vector<1x8xf32> to vector<1x8x1xf32>
    %50 = tpu.reciprocal %49 {approx = true} : vector<1x8x1xf32> -> vector<1x8x1xf32>
    %51 = vector.broadcast %50 : vector<1x8x1xf32> to vector<1x8x8xf32>
    %52 = arith.mulf %47, %51 : vector<1x8x8xf32>
    %53 = arith.truncf %52 : vector<1x8x8xf32> to vector<1x8x8xbf16>
    "tpu.trace_start"() <{level = 10 : i32, message = "bqk,bkd->bqd"}> : () -> ()
    %cst_15 = arith.constant dense<0.000000e+00> : vector<1x8x8xf32>
    %54 = tpu.matmul %53, %40, %cst_15 {dimension_numbers = #tpu.dot_dimension_numbers<[2], [1], [1], [2], [0, 0, 0, 1, 1, 2], [0], [0]>} : vector<1x8x8xbf16>, vector<1x8x8xbf16>, vector<1x8x8xf32> -> vector<1x8x8xf32>
    "tpu.trace_stop"() : () -> ()
    %55 = vector.extract_strided_slice %8 {offsets = [0, 0, 16], sizes = [1, 8, 8], strides = [1, 1, 1]} : vector<1x8x32xf32> to vector<1x8x8xf32>
    %56 = arith.truncf %55 : vector<1x8x8xf32> to vector<1x8x8xbf16>
    %57 = vector.extract_strided_slice %10 {offsets = [0, 0, 16], sizes = [1, 8, 8], strides = [1, 1, 1]} : vector<1x8x32xf32> to vector<1x8x8xf32>
    %58 = arith.truncf %57 : vector<1x8x8xf32> to vector<1x8x8xbf16>
    %59 = vector.extract_strided_slice %12 {offsets = [0, 0, 16], sizes = [1, 8, 8], strides = [1, 1, 1]} : vector<1x8x32xf32> to vector<1x8x8xf32>
    %60 = arith.truncf %59 : vector<1x8x8xf32> to vector<1x8x8xbf16>
    "tpu.trace_start"() <{level = 10 : i32, message = "bqd,bkd->bqk"}> : () -> ()
    %cst_16 = arith.constant dense<0.000000e+00> : vector<1x8x8xf32>
    %61 = tpu.matmul %56, %58, %cst_16 {dimension_numbers = #tpu.dot_dimension_numbers<[2], [2], [1], [1], [0, 0, 0, 1, 1, 1], [0], [0]>} : vector<1x8x8xbf16>, vector<1x8x8xbf16>, vector<1x8x8xf32> -> vector<1x8x8xf32>
    "tpu.trace_stop"() : () -> ()
    %62 = arith.addf %61, %14 : vector<1x8x8xf32>
    %cst_17 = arith.constant dense<0xFF800000> : vector<1x8xf32>
    %63 = vector.multi_reduction <maximumf>, %62, %cst_17 [2] : vector<1x8x8xf32> to vector<1x8xf32>
    %64 = vector.shape_cast %63 : vector<1x8xf32> to vector<1x8x1xf32>
    %65 = vector.broadcast %64 : vector<1x8x1xf32> to vector<1x8x8xf32>
    %66 = arith.subf %62, %65 : vector<1x8x8xf32>
    %67 = math.exp %66 : vector<1x8x8xf32>
    %cst_18 = arith.constant dense<0.000000e+00> : vector<1x8xf32>
    %68 = vector.multi_reduction <add>, %67, %cst_18 [2] : vector<1x8x8xf32> to vector<1x8xf32>
    %69 = vector.shape_cast %68 : vector<1x8xf32> to vector<1x8x1xf32>
    %70 = tpu.reciprocal %69 {approx = true} : vector<1x8x1xf32> -> vector<1x8x1xf32>
    %71 = vector.broadcast %70 : vector<1x8x1xf32> to vector<1x8x8xf32>
    %72 = arith.mulf %67, %71 : vector<1x8x8xf32>
    %73 = arith.truncf %72 : vector<1x8x8xf32> to vector<1x8x8xbf16>
    "tpu.trace_start"() <{level = 10 : i32, message = "bqk,bkd->bqd"}> : () -> ()
    %cst_19 = arith.constant dense<0.000000e+00> : vector<1x8x8xf32>
    %74 = tpu.matmul %73, %60, %cst_19 {dimension_numbers = #tpu.dot_dimension_numbers<[2], [1], [1], [2], [0, 0, 0, 1, 1, 2], [0], [0]>} : vector<1x8x8xbf16>, vector<1x8x8xbf16>, vector<1x8x8xf32> -> vector<1x8x8xf32>
    "tpu.trace_stop"() : () -> ()
    %75 = vector.extract_strided_slice %8 {offsets = [0, 0, 24], sizes = [1, 8, 8], strides = [1, 1, 1]} : vector<1x8x32xf32> to vector<1x8x8xf32>
    %76 = arith.truncf %75 : vector<1x8x8xf32> to vector<1x8x8xbf16>
    %77 = vector.extract_strided_slice %10 {offsets = [0, 0, 24], sizes = [1, 8, 8], strides = [1, 1, 1]} : vector<1x8x32xf32> to vector<1x8x8xf32>
    %78 = arith.truncf %77 : vector<1x8x8xf32> to vector<1x8x8xbf16>
    %79 = vector.extract_strided_slice %12 {offsets = [0, 0, 24], sizes = [1, 8, 8], strides = [1, 1, 1]} : vector<1x8x32xf32> to vector<1x8x8xf32>
    %80 = arith.truncf %79 : vector<1x8x8xf32> to vector<1x8x8xbf16>
    "tpu.trace_start"() <{level = 10 : i32, message = "bqd,bkd->bqk"}> : () -> ()
    %cst_20 = arith.constant dense<0.000000e+00> : vector<1x8x8xf32>
    %81 = tpu.matmul %76, %78, %cst_20 {dimension_numbers = #tpu.dot_dimension_numbers<[2], [2], [1], [1], [0, 0, 0, 1, 1, 1], [0], [0]>} : vector<1x8x8xbf16>, vector<1x8x8xbf16>, vector<1x8x8xf32> -> vector<1x8x8xf32>
    "tpu.trace_stop"() : () -> ()
    %82 = arith.addf %81, %14 : vector<1x8x8xf32>
    %cst_21 = arith.constant dense<0xFF800000> : vector<1x8xf32>
    %83 = vector.multi_reduction <maximumf>, %82, %cst_21 [2] : vector<1x8x8xf32> to vector<1x8xf32>
    %84 = vector.shape_cast %83 : vector<1x8xf32> to vector<1x8x1xf32>
    %85 = vector.broadcast %84 : vector<1x8x1xf32> to vector<1x8x8xf32>
    %86 = arith.subf %82, %85 : vector<1x8x8xf32>
    %87 = math.exp %86 : vector<1x8x8xf32>
    %cst_22 = arith.constant dense<0.000000e+00> : vector<1x8xf32>
    %88 = vector.multi_reduction <add>, %87, %cst_22 [2] : vector<1x8x8xf32> to vector<1x8xf32>
    %89 = vector.shape_cast %88 : vector<1x8xf32> to vector<1x8x1xf32>
    %90 = tpu.reciprocal %89 {approx = true} : vector<1x8x1xf32> -> vector<1x8x1xf32>
    %91 = vector.broadcast %90 : vector<1x8x1xf32> to vector<1x8x8xf32>
    %92 = arith.mulf %87, %91 : vector<1x8x8xf32>
    %93 = arith.truncf %92 : vector<1x8x8xf32> to vector<1x8x8xbf16>
    "tpu.trace_start"() <{level = 10 : i32, message = "bqk,bkd->bqd"}> : () -> ()
    %cst_23 = arith.constant dense<0.000000e+00> : vector<1x8x8xf32>
    %94 = tpu.matmul %93, %80, %cst_23 {dimension_numbers = #tpu.dot_dimension_numbers<[2], [1], [1], [2], [0, 0, 0, 1, 1, 2], [0], [0]>} : vector<1x8x8xbf16>, vector<1x8x8xbf16>, vector<1x8x8xf32> -> vector<1x8x8xf32>
    "tpu.trace_stop"() : () -> ()
    %95 = tpu.concatenate %34, %54, %74, %94 in 2 : vector<1x8x8xf32>, vector<1x8x8xf32>, vector<1x8x8xf32>, vector<1x8x8xf32> -> vector<1x8x32xf32>
    %96 = vector.shape_cast %95 : vector<1x8x32xf32> to vector<8x32xf32>
    %97 = arith.truncf %96 : vector<8x32xf32> to vector<8x32xbf16>
    %c0_24 = arith.constant 0 : index
    %c0_25 = arith.constant 0 : index
    %98 = vector.load %arg5[%c0_24, %c0_25] : memref<32x32xbf16, #tpu.memory_space<vmem>>, vector<32x32xbf16>
    %cst_26 = arith.constant dense<0.000000e+00> : vector<8x32xf32>
    %99 = tpu.matmul %97, %98, %cst_26 {dimension_numbers = #tpu.dot_dimension_numbers<[1], [0], [0], [1], [0, 0, 1, 1], [], []>} : vector<8x32xbf16>, vector<32x32xbf16>, vector<8x32xf32> -> vector<8x32xf32>
    %c0_27 = arith.constant 0 : index
    %c0_28 = arith.constant 0 : index
    %100 = vector.load %arg6[%c0_27, %c0_28] : memref<1x32xf32, #tpu.memory_space<vmem>>, vector<1x32xf32>
    %101 = vector.broadcast %100 : vector<1x32xf32> to vector<8x32xf32>
    %102 = arith.addf %99, %101 : vector<8x32xf32>
    %103 = arith.addf %0, %102 : vector<8x32xf32>
    %c0_29 = arith.constant 0 : index
    %c0_30 = arith.constant 0 : index
    %104 = vector.load %arg7[%c0_29, %c0_30] : memref<1x32xf32, #tpu.memory_space<vmem>>, vector<1x32xf32>
    %c0_31 = arith.constant 0 : index
    %c0_32 = arith.constant 0 : index
    %105 = vector.load %arg8[%c0_31, %c0_32] : memref<1x32xf32, #tpu.memory_space<vmem>>, vector<1x32xf32>
    %cst_33 = arith.constant dense<0.000000e+00> : vector<8xf32>
    %106 = vector.multi_reduction <add>, %103, %cst_33 [1] : vector<8x32xf32> to vector<8xf32>
    %107 = vector.shape_cast %106 : vector<8xf32> to vector<8x1xf32>
    %cst_34 = arith.constant 3.200000e+01 : f32
    %108 = vector.broadcast %cst_34 : f32 to vector<8x1xf32>
    %109 = arith.divf %107, %108 : vector<8x1xf32>
    %110 = vector.broadcast %109 : vector<8x1xf32> to vector<8x32xf32>
    %111 = arith.subf %103, %110 : vector<8x32xf32>
    %112 = arith.mulf %111, %111 : vector<8x32xf32>
    %cst_35 = arith.constant dense<0.000000e+00> : vector<8xf32>
    %113 = vector.multi_reduction <add>, %112, %cst_35 [1] : vector<8x32xf32> to vector<8xf32>
    %114 = vector.shape_cast %113 : vector<8xf32> to vector<8x1xf32>
    %cst_36 = arith.constant 3.200000e+01 : f32
    %115 = vector.broadcast %cst_36 : f32 to vector<8x1xf32>
    %116 = arith.divf %114, %115 : vector<8x1xf32>
    %cst_37 = arith.constant 9.99999974E-6 : f32
    %117 = vector.broadcast %cst_37 : f32 to vector<8x1xf32>
    %118 = arith.addf %116, %117 : vector<8x1xf32>
    %119 = math.rsqrt %118 : vector<8x1xf32>
    %120 = vector.broadcast %109 : vector<8x1xf32> to vector<8x32xf32>
    %121 = arith.subf %103, %120 : vector<8x32xf32>
    %122 = vector.broadcast %119 : vector<8x1xf32> to vector<8x32xf32>
    %123 = arith.mulf %121, %122 : vector<8x32xf32>
    %124 = vector.broadcast %104 : vector<1x32xf32> to vector<8x32xf32>
    %125 = arith.mulf %123, %124 : vector<8x32xf32>
    %126 = vector.broadcast %105 : vector<1x32xf32> to vector<8x32xf32>
    %127 = arith.addf %125, %126 : vector<8x32xf32>
    %128 = arith.truncf %127 : vector<8x32xf32> to vector<8x32xbf16>
    %cst_38 = arith.constant 0.000000e+00 : f32
    %129 = vector.broadcast %cst_38 : f32 to vector<8x32xf32>
    %c0_39 = arith.constant 0 : index
    %c0_40 = arith.constant 0 : index
    %130 = vector.load %arg9[%c0_39, %c0_40] : memref<32x64xbf16, #tpu.memory_space<vmem>>, vector<32x64xbf16>
    %cst_41 = arith.constant dense<0.000000e+00> : vector<8x64xf32>
    %131 = tpu.matmul %128, %130, %cst_41 {dimension_numbers = #tpu.dot_dimension_numbers<[1], [0], [0], [1], [0, 0, 1, 1], [], []>} : vector<8x32xbf16>, vector<32x64xbf16>, vector<8x64xf32> -> vector<8x64xf32>
    %c0_42 = arith.constant 0 : index
    %c0_43 = arith.constant 0 : index
    %132 = vector.load %arg10[%c0_42, %c0_43] : memref<1x64xf32, #tpu.memory_space<vmem>>, vector<1x64xf32>
    %133 = vector.broadcast %132 : vector<1x64xf32> to vector<8x64xf32>
    %134 = arith.addf %131, %133 : vector<8x64xf32>
    %cst_44 = arith.constant 0.000000e+00 : f32
    %135 = vector.broadcast %cst_44 : f32 to vector<8x64xf32>
    %136 = arith.maximumf %134, %135 : vector<8x64xf32>
    %137 = arith.truncf %136 : vector<8x64xf32> to vector<8x64xbf16>
    %c0_45 = arith.constant 0 : index
    %c0_46 = arith.constant 0 : index
    %138 = vector.load %arg11[%c0_45, %c0_46] : memref<64x32xbf16, #tpu.memory_space<vmem>>, vector<64x32xbf16>
    %cst_47 = arith.constant dense<0.000000e+00> : vector<8x32xf32>
    %139 = tpu.matmul %137, %138, %cst_47 {dimension_numbers = #tpu.dot_dimension_numbers<[1], [0], [0], [1], [0, 0, 1, 1], [], []>} : vector<8x64xbf16>, vector<64x32xbf16>, vector<8x32xf32> -> vector<8x32xf32>
    %140 = arith.addf %129, %139 : vector<8x32xf32>
    %c0_48 = arith.constant 0 : index
    %c0_49 = arith.constant 0 : index
    %141 = vector.load %arg12[%c0_48, %c0_49] : memref<1x32xf32, #tpu.memory_space<vmem>>, vector<1x32xf32>
    %142 = vector.broadcast %141 : vector<1x32xf32> to vector<8x32xf32>
    %143 = arith.addf %140, %142 : vector<8x32xf32>
    %144 = arith.addf %127, %143 : vector<8x32xf32>
    %c0_50 = arith.constant 0 : index
    %c0_51 = arith.constant 0 : index
    %145 = vector.load %arg13[%c0_50, %c0_51] : memref<1x32xf32, #tpu.memory_space<vmem>>, vector<1x32xf32>
    %c0_52 = arith.constant 0 : index
    %c0_53 = arith.constant 0 : index
    %146 = vector.load %arg14[%c0_52, %c0_53] : memref<1x32xf32, #tpu.memory_space<vmem>>, vector<1x32xf32>
    %cst_54 = arith.constant dense<0.000000e+00> : vector<8xf32>
    %147 = vector.multi_reduction <add>, %144, %cst_54 [1] : vector<8x32xf32> to vector<8xf32>
    %148 = vector.shape_cast %147 : vector<8xf32> to vector<8x1xf32>
    %cst_55 = arith.constant 3.200000e+01 : f32
    %149 = vector.broadcast %cst_55 : f32 to vector<8x1xf32>
    %150 = arith.divf %148, %149 : vector<8x1xf32>
    %151 = vector.broadcast %150 : vector<8x1xf32> to vector<8x32xf32>
    %152 = arith.subf %144, %151 : vector<8x32xf32>
    %153 = arith.mulf %152, %152 : vector<8x32xf32>
    %cst_56 = arith.constant dense<0.000000e+00> : vector<8xf32>
    %154 = vector.multi_reduction <add>, %153, %cst_56 [1] : vector<8x32xf32> to vector<8xf32>
    %155 = vector.shape_cast %154 : vector<8xf32> to vector<8x1xf32>
    %cst_57 = arith.constant 3.200000e+01 : f32
    %156 = vector.broadcast %cst_57 : f32 to vector<8x1xf32>
    %157 = arith.divf %155, %156 : vector<8x1xf32>
    %cst_58 = arith.constant 9.99999974E-6 : f32
    %158 = vector.broadcast %cst_58 : f32 to vector<8x1xf32>
    %159 = arith.addf %157, %158 : vector<8x1xf32>
    %160 = math.rsqrt %159 : vector<8x1xf32>
    %161 = vector.broadcast %150 : vector<8x1xf32> to vector<8x32xf32>
    %162 = arith.subf %144, %161 : vector<8x32xf32>
    %163 = vector.broadcast %160 : vector<8x1xf32> to vector<8x32xf32>
    %164 = arith.mulf %162, %163 : vector<8x32xf32>
    %165 = vector.broadcast %145 : vector<1x32xf32> to vector<8x32xf32>
    %166 = arith.mulf %164, %165 : vector<8x32xf32>
    %167 = vector.broadcast %146 : vector<1x32xf32> to vector<8x32xf32>
    %168 = arith.addf %166, %167 : vector<8x32xf32>
    %c0_59 = arith.constant 0 : index
    %c0_60 = arith.constant 0 : index
    %169 = vector.load %arg15[%c0_59, %c0_60] : memref<8x32xf32, #tpu.memory_space<vmem>>, vector<8x32xf32>
    tpu.vector_store %arg15[%c0_59, %c0_60], %168 {strides = array<i32>} : memref<8x32xf32, #tpu.memory_space<vmem>>, vector<8x32xf32>,
    return
  }
  func.func @transform_0(%arg0: i32) -> (i32, i32) {
    %c0_i32 = arith.constant 0 : i32
    %c0_i32_0 = arith.constant 0 : i32
    return %arg0, %c0_i32 : i32, i32
  }
  func.func @transform_1(%arg0: i32) -> (i32, i32, i32) {
    %c0_i32 = arith.constant 0 : i32
    %c0_i32_0 = arith.constant 0 : i32
    %c0_i32_1 = arith.constant 0 : i32
    return %arg0, %c0_i32, %c0_i32_0 : i32, i32, i32
  }
  func.func @transform_2(%arg0: i32) -> (i32, i32) {
    %c0_i32 = arith.constant 0 : i32
    %c0_i32_0 = arith.constant 0 : i32
    %c0_i32_1 = arith.constant 0 : i32
    return %c0_i32, %c0_i32_0 : i32, i32
  }
  func.func @transform_3(%arg0: i32) -> (i32, i32) {
    %c0_i32 = arith.constant 0 : i32
    %c0_i32_0 = arith.constant 0 : i32
    %c0_i32_1 = arith.constant 0 : i32
    return %c0_i32, %c0_i32_0 : i32, i32
  }
  func.func @transform_4(%arg0: i32) -> (i32, i32) {
    %c0_i32 = arith.constant 0 : i32
    %c0_i32_0 = arith.constant 0 : i32
    %c0_i32_1 = arith.constant 0 : i32
    return %c0_i32, %c0_i32_0 : i32, i32
  }
  func.func @transform_5(%arg0: i32) -> (i32, i32) {
    %c0_i32 = arith.constant 0 : i32
    %c0_i32_0 = arith.constant 0 : i32
    %c0_i32_1 = arith.constant 0 : i32
    return %c0_i32, %c0_i32_0 : i32, i32
  }
  func.func @transform_6(%arg0: i32) -> (i32, i32) {
    %c0_i32 = arith.constant 0 : i32
    %c0_i32_0 = arith.constant 0 : i32
    %c0_i32_1 = arith.constant 0 : i32
    return %c0_i32, %c0_i32_0 : i32, i32
  }
  func.func @transform_7(%arg0: i32) -> (i32, i32) {
    %c0_i32 = arith.constant 0 : i32
    %c0_i32_0 = arith.constant 0 : i32
    %c0_i32_1 = arith.constant 0 : i32
    return %c0_i32, %c0_i32_0 : i32, i32
  }
  func.func @transform_8(%arg0: i32) -> (i32, i32) {
    %c0_i32 = arith.constant 0 : i32
    %c0_i32_0 = arith.constant 0 : i32
    %c0_i32_1 = arith.constant 0 : i32
    return %c0_i32, %c0_i32_0 : i32, i32
  }
  func.func @transform_9(%arg0: i32) -> (i32, i32) {
    %c0_i32 = arith.constant 0 : i32
    %c0_i32_0 = arith.constant 0 : i32
    %c0_i32_1 = arith.constant 0 : i32
    return %c0_i32, %c0_i32_0 : i32, i32
  }
  func.func @transform_10(%arg0: i32) -> (i32, i32) {
    %c0_i32 = arith.constant 0 : i32
    %c0_i32_0 = arith.constant 0 : i32
    %c0_i32_1 = arith.constant 0 : i32
    return %c0_i32, %c0_i32_0 : i32, i32
  }
  func.func @transform_11(%arg0: i32) -> (i32, i32) {
    %c0_i32 = arith.constant 0 : i32
    %c0_i32_0 = arith.constant 0 : i32
    %c0_i32_1 = arith.constant 0 : i32
    return %c0_i32, %c0_i32_0 : i32, i32
  }
  func.func @transform_12(%arg0: i32) -> (i32, i32) {
    %c0_i32 = arith.constant 0 : i32
    %c0_i32_0 = arith.constant 0 : i32
    %c0_i32_1 = arith.constant 0 : i32
    return %c0_i32, %c0_i32_0 : i32, i32
  }
  func.func @transform_13(%arg0: i32) -> (i32, i32) {
    %c0_i32 = arith.constant 0 : i32
    %c0_i32_0 = arith.constant 0 : i32
    %c0_i32_1 = arith.constant 0 : i32
    return %c0_i32, %c0_i32_0 : i32, i32
  }
  func.func @transform_14(%arg0: i32) -> (i32, i32) {
    %c0_i32 = arith.constant 0 : i32
    %c0_i32_0 = arith.constant 0 : i32
    return %arg0, %c0_i32 : i32, i32
  }
}

</mosaic_0001>

<bundles_post_ra>
// kernel: encoder_layer.1
= control target key start
LH: loop header
LB: loop body
LE: loop exit
PB: predicated region body
PF: predicated region fallthrough
CT: control target
= control target key end

     0   :  { %s2131_s0 = inlined_call_operand.vmem [shape: f32[16,32], index: 0, kind: input, shape index: {}]   ;;  %s2132_s1 = inlined_call_operand.vmem [shape: bf16[2,8,8], index: 1, kind: input, shape index: {}]   ;;  %s2133_s2 = inlined_call_operand.vmem [shape: bf16[32,96], index: 2, kind: input, shape index: {}]   ;;  %s2134_s3 = inlined_call_operand.vmem [shape: f32[1,96], index: 3, kind: input, shape index: {}]   ;;  %s2135_s4 = inlined_call_operand.vmem [shape: bf16[32,32], index: 4, kind: input, shape index: {}]   ;;  %s2136_s5 = inlined_call_operand.vmem [shape: f32[1,32], index: 5, kind: input, shape index: {}]   ;;  %s2137_s6 = inlined_call_operand.vmem [shape: f32[1,32], index: 6, kind: input, shape index: {}]   ;;  %s2138_s7 = inlined_call_operand.vmem [shape: f32[1,32], index: 7, kind: input, shape index: {}]   ;;  %s2139_s8 = inlined_call_operand.vmem [shape: bf16[32,64], index: 8, kind: input, shape index: {}]   ;;  %s2140_s9 = inlined_call_operand.hbm [shape: f32[1,64], index: 9, kind: input, shape index: {}]   ;;  %s2141_s10 = inlined_call_operand.vmem [shape: bf16[64,32], index: 10, kind: input, shape index: {}]   ;;  %s2142_s11 = inlined_call_operand.vmem [shape: f32[1,32], index: 11, kind: input, shape index: {}]   ;;  %s2143_s12 = inlined_call_operand.vmem [shape: f32[1,32], index: 12, kind: input, shape index: {}]   ;;  %s2144_s13 = inlined_call_operand.vmem [shape: f32[1,32], index: 13, kind: input, shape index: {}]   ;;  %s2145_s14 = inlined_call_operand.hbm [shape: f32[16,32], index: 14, kind: output, shape index: {}]  }
   0x1   :  { %2153 = sst [smem:[#allocation12_spill]] %s2131_s0 }
   0x2   :  { %19 = vsyncpa [#allocation3], 0 }
   0x3   :  { %20 = vsyncpa [#allocation4], 0 }
   0x4   :  { %22 = vsyncpa [#allocation4 + $0x1], 0  ;;  %s1844_s29 = smov 0   ;;  %s1846_s30 = smov 0  }
   0x5   :  { %s1848_s15 = smov 0   ;;  %s1850_s16 = smov 0  }
   0x6 LB: > { %2154 = sst [smem:[#allocation8_spill]] %s1745_s15  ;;  %s1865_s17 = sadd.s32 4294967295, %s1749_s16   ;;  %s1749_s16 = sphi %s1850_s16, %s2169_s16   ;;  %s1745_s15 = sphi %s1848_s15, %s2171_s15   ;;  %s1741_s30 = sphi %s1846_s30, %s2173_s30   ;;  %s1737_s29 = sphi %s1844_s29, %s2172_s29  }
   0x7   : > { %s1402_s18 = sadd.s32 4294967294, %s1749_s16   ;;  %s1869_s19 = sadd.s32 1, %s1749_s16  }
   0x8   : > { %2155 = sst [smem:[#allocation9_spill]] %s1869_s19  ;;  %s339_s20 = sadd.s32 1, %s1745_s15 }
   0x9   : > { %s336_s21 = ssub.s32 %s1749_s16, %s1869_s19  ;;  %p349_p0 = scmp.ne.s32.totalorder %s1745_s15, %s1741_s30 }
   0xa   : > { %p337_p1 = scmp.eq.s32.totalorder %s336_s21, 0  ;;  %p350_p2 = scmp.eq.s32.totalorder %s1865_s17, 1 }
   0xb   : > { %p355_p3 = scmp.ne.s32.totalorder %s1741_s30, %s1737_s29  ;;  %p356_p4 = scmp.eq.s32.totalorder %s1402_s18, 1 }
   0xc   : > { %s1880_s22 = scalar_select %p337_p1, %s1745_s15, %s339_s20  }
   0xd   : > { %p1882_p5 = por %p350_p2, %p349_p0  ;;  %p1886_p6 = por %p356_p4, %p355_p3 }
   0xe   : > { %2156 = sst [smem:[#allocation10_spill]] %s1880_s22  ;;  %p1403_p7 = scmp.ge.s32.totalorder %s1749_s16, 1 }
   0xf   : > { %s2157_s23 = scalar_select %p1882_p5, 1, 0 }
  0x10   : > { %s2158_s24 = scalar_select %p1886_p6, 1, 0 }
  0x11   : > { %p363_p8 = scmp.lt.s32.totalorder %s1749_s16, 3  ;;  %p2150_p9 = scmp.eq.s32.totalorder %s1865_s17, 0 }
  0x12   : > { %2159 = sst [smem:[#allocation11_spill]] %s2158_s24  ;;  %s1751_s26 = smov [#allocation2]  }
  0x13   : > { %p1893_p10 = pnand %p1403_p7, %p363_p8  ;;  %s397_s27 = sshll.u32 %s1751_s26, 4  ;;  %s398_s27 = int_to_ptr.vmem [resolvable:$true] %s397_s27 }
  0x14   : > { %s1655_s21 = scalar_lea.hbm %s2140_s9, 16 }
  0x15   : > { %s2160_s25 = scalar_select %p1893_p10, 1, 0 }
  0x16   : > { %p1565_p11 = pneg %p1893_p10  ;;  %p1656_p13 = scmp.ne.s32.totalorder %s2140_s9, %s1655_s21 }
  0x17   : > { %p1662_p3 = scmp.lt.u32.totalorder %s1655_s21, %s2140_s9 }
  0x18   : > { %p1901_p12 = pnand %p2150_p9, %p1565_p11 }
  0x1a   : > { %p1657_p0 = pneg %p1901_p12 }
  0x1c   : > { %p1658_p1 = pnand %p1657_p0, %p1656_p13 }
  0x1e   : > { %p1659_p2 = pneg %p1658_p1 }
  0x20   : > { %p1664_p4 = pnand %p1662_p3, %p1659_p2 }
  0x22   : > { %1667 = shalt.err (!%p1664_p4)
}
  0x23   : > { %s1668_s24 = scalar_lea.vmem %s398_s27, 16  ;;  %s1675_s18 = scalar_lea.vmem %s398_s27, 32 }
  0x24   : > { %p1669_p7 = scmp.ne.s32.totalorder %s398_s27, %s1668_s24  ;;  %p1676_p9 = scmp.lt.s32.totalorder %s398_s27, %s398_s27 }
  0x25   : > { %p1677_p6 = scmp.lt.s32.totalorder %s1675_s18, %s1668_s24 }
  0x26   : > { %p1671_p8 = pnand %p1669_p7, %p1657_p0 }
  0x27   : > { %p1678_p5 = por %p1677_p6, %p1676_p9 }
  0x28   : > { %p1672_p11 = pneg %p1671_p8 }
  0x2a   : > { %p1679_p10 = pnand %p1678_p5, %p1672_p11 }
  0x2c   : > { %1682 = shalt.err (!%p1679_p10)
}
  0x2d   : > { %1568 = dma.hbm_to_vmem [thread:$0]  (!%p1901_p12), %s2140_s9, 16, %s398_s27, [#allocation3]  }
  0x2e   : > { %p2162_p13 = scmp.ne.s32.totalorder %s2160_s25, 0 }
  0x2f   : > { %p2163_p1 = scmp.eq.s32.totalorder (!%p2162_p13), %s1865_s17, 0 }
  0x30   : > { %436 = sbr.rel (%p2162_p13) target bundleno = 2619 (0xa3b), region = 76 }
  0x37   : > { %1728 = dma.done.wait (%p2163_p1), [#allocation3], 16   ;;  %p2164_p0 = pmov %p2163_p1 }
  0x38   : > { %p485_p6 = scmp.lt.s32.totalorder %s1865_s17, 1  ;;  %v1752_v0 = vmov 0.0   ;;  %vm1753_vm0 = vmmov 0   ;;  %s2165_s0 = sld [smem:[#allocation12_spill]]  ;;  %v1625_v1 = vld [vmem:[%s2133_s2] sm:$0xff]   ;;  %v1626_v2 = vld [vmem:[%s2133_s2 + $0x8] sm:$0xff]  }
  0x39   : > { %1730 = vsyncadd (%p2164_p0), [#allocation3], 4294967280  ;;  %1475 = vmatprep.subr.bf16.mxu0 %v1752_v0  ;;  %1479 = vmatprep.mubr.msk.bf16.mxu0 %vm1753_vm0, %v1752_v0  ;;  %vm519_vm1 = vcmask 261120   ;;  %v1411_v5 = vld [vmem:[%s2134_s3] ss:$0 sm:$0xff]  ;;  %s1755_s25 = smov 96  }
  0x3a   : > { %s1932_s19 = scalar_select %p485_p6, %s1865_s17, 1  ;;  %1483 = vmatprep.subr.bf16.mxu1 %v1752_v0  ;;  %1485 = vmatprep.mubr.msk.bf16.mxu1 %vm1753_vm0, %v1752_v0  ;;  %vm569_vm2 = vcmask 64512   ;;  %vm633_vm3 = vcmask 1043456   ;;  %vm1020_vm4 = vcmask 130048   ;;  %vm1022_vm5 = vcmask 195584  }
  0x3b   : > { %1476 = vmatpush3.bf16.msra.mxu0 %v1625_v1  ;;  %s1756_s27 = smov 80   ;;  %s1758_s20 = smov 72   ;;  %vm1230_vm6 = vcmask 523264  }
  0x3c   : > { %s1409_s24 = sshll.u32 %s1932_s19, 3  ;;  %1477 = vmatprep.subr.bf16.mxu0 %v1752_v0  ;;  %s1759_s21 = smov 112  }
  0x3d   : > { %s1760_s26 = smov 104   ;;  %s1410_s18 = sshll.u32 %s1932_s19, 2 }
  0x3e   : > { %s488_s28 = scalar_lea.vmem %s2165_s0, %s1409_s24  ;;  %s1754_s24 = smov 120  }
  0x3f   : > { %v1947_v3 = vld [vmem:[%s488_s28] sm:$0xff]  ;;  %1478 = vmatpush3.bf16.msra.mxu0 %v1626_v2  ;;  %s1757_s28 = smov 88   ;;  %s1761_s19 = smov 56  }
  0x40   : > { %v495_v4 = vpack.c.bf16 %v1947_v3, %v1947_v3  ;;  %1489 = vmatprep.subr.bf16.mxu0 %v1752_v0  ;;  %s1766_s22 = smov 16   ;;  %p2166_p9 = scmp.ne.s32.totalorder %s2157_s23, 0 }
  0x42   : > { %1480 = vmatmul.mubr.msk.bf16.vlgmr.msra.gmra.mrb[0].mxu0 %vm519_vm1, %v495_v4 }
  0x43   : > { %1491 = vmatprep.mubr.msk.bf16.mxu0 %vm1753_vm0, %v1752_v0 }
 0x115   : > { %v557_v6 = vpop.f32.mrb[0].mxu0 }
 0x116   : > { %v558_v7 = vadd.f32 %v1411_v5, %v557_v6  ;;  %v1481_v8 = vpop.f32.mrb[1].mxu0 }
 0x117   : > { %v560_v9 = vpop.f32.mrb[2].mxu0 }
 0x118   : > { %v1959_v10 = vpack.c.bf16 %v558_v7, %v558_v7  ;;  %v1482_v11 = vpop.f32.mrb[3].mxu0 }
 0x11a   : > { %677 = vrot.lane.b32.xlu1 %v1959_v10, %s1754_s24  ;;  %567 = vrot.lane.b32.xlu0 %v1959_v10, %s1755_s25  ;;  %s492_s24 = scalar_lea.vmem %s2132_s1, %s1410_s18  ;;  %s1762_s25 = smov 64  }
 0x11b   : > { %v563_v23 = vld [vmem:[%s492_s24] sm:$0xf]  ;;  %s1767_s24 = smov 24  }
 0x11c   : > { %v564_v24 = vunpack.c.l.bf16 %v563_v23 }
 0x11e   : > { %789 = vrot.lane.b32.xlu1 %v1959_v10, %s1756_s27  ;;  %679 = vrot.lane.b32.xlu0 %v1959_v10, %s1757_s28  ;;  %s1763_s27 = smov 40   ;;  %s1764_s28 = smov 48  }
 0x122   : > { %899 = vrot.lane.b32.xlu1 %v1959_v10, %s1758_s20  ;;  %787 = vrot.lane.b32.xlu0 %v1959_v10, %s1759_s21  ;;  %s1765_s20 = smov 8  }
 0x126   : > { %897 = vrot.lane.b32.xlu0 %v1959_v10, %s1760_s26 }
 0x18c   : > { %v568_v12 = vpop.permute.xlu0 %567  ;;  %v678_v15 = vpop.permute.xlu1 %677 }
 0x18d   : > { %v574_v13 = vsel %vm569_vm2, %v568_v12, 0 }
 0x18e   : > { %1484 = vmatpush3.bf16.xpose.msra.mxu1 %v574_v13 }
 0x18f   : > { %1495 = vmatprep.subr.bf16.mxu1 %v1752_v0 }
 0x190   : > { %v680_v14 = vpop.permute.xlu0 %679  ;;  %v790_v17 = vpop.permute.xlu1 %789 }
 0x191   : > { %v685_v16 = vsel %vm569_vm2, %v680_v14, 0  ;;  %v795_v18 = vsel %vm569_vm2, %v790_v17, 0 }
 0x194   : > { %v900_v19 = vpop.permute.xlu1 %899  ;;  %v788_v20 = vpop.permute.xlu0 %787 }
 0x195   : > { %1486 = vmatmul.mubr.msk.bf16.vlgmr.msra.gmra.mrb[0].mxu1 %vm569_vm2, %v1959_v10  ;;  %v905_v21 = vsel %vm569_vm2, %v900_v19, 0 }
 0x196   : > { %1496 = vmatpush3.bf16.xpose.msra.mxu1 %v685_v16  ;;  %1497 = vmatprep.mubr.msk.bf16.mxu1 %vm1753_vm0, %v1752_v0 }
 0x197   : > { %1507 = vmatprep.subr.bf16.mxu1 %v1752_v0 }
 0x198   : > { %v898_v22 = vpop.permute.xlu0 %897 }
 0x19d   : > { %1498 = vmatmul.mubr.msk.bf16.vlgmr.msra.gmra.mrb[4].mxu1 %vm569_vm2, %v678_v15 }
 0x19e   : > { %1508 = vmatpush3.bf16.xpose.msra.mxu1 %v795_v18  ;;  %1509 = vmatprep.mubr.msk.bf16.mxu1 %vm1753_vm0, %v1752_v0 }
 0x19f   : > { %1519 = vmatprep.subr.bf16.mxu1 %v1752_v0 }
 0x1a5   : > { %1510 = vmatmul.mubr.msk.bf16.vlgmr.msra.gmra.mrb[8].mxu1 %vm569_vm2, %v788_v20 }
 0x1a6   : > { %1520 = vmatpush3.bf16.xpose.msra.mxu1 %v905_v21  ;;  %1521 = vmatprep.mubr.msk.bf16.mxu1 %vm1753_vm0, %v1752_v0 }
 0x1a7   : > { %1531 = vmatprep.subr.bf16.mxu1 %v1752_v0 }
 0x1ad   : > { %1522 = vmatmul.mubr.msk.bf16.vlgmr.msra.gmra.mrb[12].mxu1 %vm569_vm2, %v898_v22 }
 0x1ae   : > { %1535 = vmatprep.mubr.msk.bf16.mxu1 %vm1753_vm0, %v1752_v0 }
 0x268   : > { %v610_v25 = vpop.f32.mrb[0].mxu1 }
 0x269   : > { %v611_v26 = vadd.f32 %v610_v25, %v564_v24  ;;  %v1487_v27 = vpop.f32.mrb[1].mxu1 }
 0x26a   : > { %v613_v28 = vpop.f32.mrb[2].mxu1 }
 0x26b   : > { %v1488_v29 = vpop.f32.mrb[3].mxu1  ;;  %v616_v30 = vsel %vm569_vm2, %v611_v26, -inf }
 0x26c   : > { %617 = vmax.xlane.f32.xlu1 %v616_v30 }
 0x270   : > { %v721_v31 = vpop.f32.mrb[4].mxu1 }
 0x271   : > { %v722_v32 = vadd.f32 %v721_v31, %v564_v24  ;;  %v1499_v33 = vpop.f32.mrb[5].mxu1 }
 0x272   : > { %v724_v34 = vpop.f32.mrb[6].mxu1 }
 0x273   : > { %v1500_v35 = vpop.f32.mrb[7].mxu1  ;;  %v727_v36 = vsel %vm569_vm2, %v722_v32, -inf }
 0x274   : > { %728 = vmax.xlane.f32.xlu0 %v727_v36 }
 0x278   : > { %v831_v37 = vpop.f32.mrb[8].mxu1 }
 0x279   : > { %v832_v38 = vadd.f32 %v831_v37, %v564_v24  ;;  %v1511_v39 = vpop.f32.mrb[9].mxu1 }
 0x27a   : > { %v834_v40 = vpop.f32.mrb[10].mxu1  ;;  %v1627_v39 = vld [vmem:[%s2135_s4] sm:$0xff]  }
 0x27b   : > { %v1512_v41 = vpop.f32.mrb[11].mxu1  ;;  %v837_v42 = vsel %vm569_vm2, %v832_v38, -inf  ;;  %1532 = vmatpush3.bf16.msra.mxu1 %v1627_v39  ;;  %v1628_v40 = vld [vmem:[%s2135_s4 + $0x8] sm:$0xff]  }
 0x27c   : > { %838 = vmax.xlane.f32.xlu0 %v837_v42  ;;  %1533 = vmatprep.subr.bf16.mxu1 %v1752_v0 }
 0x27f   : > { %1534 = vmatpush3.bf16.msra.mxu1 %v1628_v40 }
 0x280   : > { %v941_v43 = vpop.f32.mrb[12].mxu1  ;;  %1547 = vmatprep.subr.bf16.mxu1 %v1752_v0 }
 0x281   : > { %v942_v44 = vadd.f32 %v941_v43, %v564_v24  ;;  %v1523_v45 = vpop.f32.mrb[13].mxu1 }
 0x282   : > { %v944_v46 = vpop.f32.mrb[14].mxu1 }
 0x283   : > { %v1524_v47 = vpop.f32.mrb[15].mxu1  ;;  %v947_v48 = vsel %vm569_vm2, %v942_v44, -inf }
 0x284   : > { %948 = vmax.xlane.f32.xlu1 %v947_v48 }
 0x2f9   : > { %v618_v49 = vpop.xlane.xlu1 %617 }
 0x2fa   : > { %v619_v50 = vsub.f32 %v611_v26, %v618_v49 }
 0x2fc   : > { %v620_v51 = vmul.f32 1.442695, %v619_v50 }
 0x2fe   : > { %1635 = vpow2.f32 %v620_v51 }
 0x301   : > { %v729_v52 = vpop.xlane.xlu0 %728 }
 0x302   : > { %v730_v53 = vsub.f32 %v722_v32, %v729_v52 }
 0x304   : > { %v731_v54 = vmul.f32 1.442695, %v730_v53 }
 0x306   : > { %1637 = vpow2.f32 %v731_v54 }
 0x308   : > { %v1636_v55 = vpop.eup %1635 }
 0x309   : > { %v839_v56 = vpop.xlane.xlu0 %838  ;;  %v622_v57 = vsel %vm569_vm2, %v1636_v55, 0.0 }
 0x30a   : > { %v840_v58 = vsub.f32 %v832_v38, %v839_v56  ;;  %623 = vadd.xlane.f32.xlu0 %v622_v57  ;;  %v1423_v56 = vld [vmem:[%s2136_s5] ss:$0 sm:$0xff] }
 0x30c   : > { %v841_v59 = vmul.f32 1.442695, %v840_v58 }
 0x30e   : > { %1639 = vpow2.f32 %v841_v59 }
 0x310   : > { %v1638_v60 = vpop.eup %1637 }
 0x311   : > { %v733_v61 = vsel %vm569_vm2, %v1638_v60, 0.0  ;;  %v949_v1 = vpop.xlane.xlu1 %948 }
 0x312   : > { %734 = vadd.xlane.f32.xlu1 %v733_v61  ;;  %v950_v2 = vsub.f32 %v942_v44, %v949_v1 }
 0x314   : > { %v951_v4 = vmul.f32 1.442695, %v950_v2 }
 0x316   : > { %1641 = vpow2.f32 %v951_v4 }
 0x318   : > { %v1640_v62 = vpop.eup %1639 }
 0x319   : > { %v843_v63 = vsel %vm569_vm2, %v1640_v62, 0.0 }
 0x31a   : > { %844 = vadd.xlane.f32.xlu0 %v843_v63 }
 0x320   : > { %v1642_v5 = vpop.eup %1641 }
 0x321   : > { %v953_v6 = vsel %vm569_vm2, %v1642_v5, 0.0 }
 0x323   : > { %739 = vrot.lane.b32.xlu1 %v1959_v10, %s1761_s19 }
 0x330   : > { %628 = vrot.lane.b32.xlu0 %v1959_v10, %s1762_s25 }
 0x334   : > { %959 = vrot.lane.b32.xlu0 %v1959_v10, %s1763_s27 }
 0x347   : > { %954 = vadd.xlane.f32.xlu1 %v953_v6 }
 0x358   : > { %849 = vrot.lane.b32.xlu1 %v1959_v10, %s1764_s28 }
 0x397   : > { %v624_v7 = vpop.xlane.xlu0 %623 }
 0x398   : > { %1643 = vrcp.f32 %v624_v7  ;;  %v1629_v7 = vld [vmem:[%s2139_s8] sm:$0xff]  }
 0x39f   : > { %v735_v8 = vpop.xlane.xlu1 %734 }
 0x3a0   : > { %1645 = vrcp.f32 %v735_v8  ;;  %v1631_v8 = vld [vmem:[%s2141_s10] sm:$0xff]  }
 0x3a2   : > { %v1644_v9 = vpop.eup %1643 }
 0x3a3   : > { %v626_v12 = vmul.f32 %v1644_v9, %v1636_v55  ;;  %v740_v15 = vpop.permute.xlu1 %739  ;;  %v1632_v9 = vld [vmem:[%s2141_s10 + $0x8] sm:$0xff]  }
 0x3a4   : > { %v745_v18 = vsel %vm633_vm3, %v740_v15, 0  ;;  %v1427_v15 = vld [vmem:[%s2137_s6] ss:$0 sm:$0xff] }
 0x3a5   : > { %v627_v16 = vpack.c.bf16 %v626_v12, %v626_v12 }
 0x3a7   : > { %v845_v11 = vpop.xlane.xlu0 %844 }
 0x3a8   : > { %1647 = vrcp.f32 %v845_v11 }
 0x3aa   : > { %v1646_v17 = vpop.eup %1645 }
 0x3ab   : > { %v629_v13 = vpop.permute.xlu0 %628  ;;  %v737_v10 = vmul.f32 %v1646_v17, %v1638_v60  ;;  %v1428_v17 = vld [vmem:[%s2138_s7] ss:$0 sm:$0xff] }
 0x3ac   : > { %v635_v14 = vsel %vm633_vm3, %v629_v13, 0 }
 0x3ad   : > { %1490 = vmatpush3.bf16.msra.mxu0 %v635_v14  ;;  %v738_v19 = vpack.c.bf16 %v737_v10, %v737_v10 }
 0x3ae   : > { %1501 = vmatprep.subr.bf16.mxu0 %v1752_v0 }
 0x3af   : > { %v960_v25 = vpop.permute.xlu0 %959 }
 0x3b0   : > { %1492 = vmatmul.mubr.msk.bf16.vlgmr.msra.gmra.mrb[4].mxu0 %vm569_vm2, %v627_v16  ;;  %v965_v27 = vsel %vm633_vm3, %v960_v25, 0 }
 0x3b1   : > { %1502 = vmatpush3.bf16.msra.mxu0 %v745_v18  ;;  %1503 = vmatprep.mubr.msk.bf16.mxu0 %vm1753_vm0, %v1752_v0 }
 0x3b2   : > { %1513 = vmatprep.subr.bf16.mxu0 %v1752_v0  ;;  %v1648_v20 = vpop.eup %1647 }
 0x3b3   : > { %v847_v22 = vmul.f32 %v1648_v20, %v1640_v62  ;;  %v1633_v20 = vld [vmem:[%s2141_s10 + $0x10] sm:$0xff]  }
 0x3b5   : > { %v848_v26 = vpack.c.bf16 %v847_v22, %v847_v22  ;;  %v1429_v22 = vld [vmem:[#allocation2] ss:$0 sm:$0xff] }
 0x3b8   : > { %1504 = vmatmul.mubr.msk.bf16.vlgmr.msra.gmra.mrb[8].mxu0 %vm569_vm2, %v738_v19 }
 0x3b9   : > { %1515 = vmatprep.mubr.msk.bf16.mxu0 %vm1753_vm0, %v1752_v0 }
 0x3d4   : > { %v955_v21 = vpop.xlane.xlu1 %954 }
 0x3d5   : > { %1649 = vrcp.f32 %v955_v21  ;;  %v1634_v21 = vld [vmem:[%s2141_s10 + $0x18] sm:$0xff]  }
 0x3d8   : > { %v850_v23 = vpop.permute.xlu1 %849 }
 0x3d9   : > { %v855_v24 = vsel %vm633_vm3, %v850_v23, 0 }
 0x3da   : > { %1514 = vmatpush3.bf16.msra.mxu0 %v855_v24 }
 0x3db   : > { %1525 = vmatprep.subr.bf16.mxu0 %v1752_v0 }
 0x3dd   : > { %1516 = vmatmul.mubr.msk.bf16.vlgmr.msra.gmra.mrb[12].mxu0 %vm569_vm2, %v848_v26 }
 0x3de   : > { %1526 = vmatpush3.bf16.msra.mxu0 %v965_v27  ;;  %1527 = vmatprep.mubr.msk.bf16.mxu0 %vm1753_vm0, %v1752_v0 }
 0x3df   : > { %v1650_v28 = vpop.eup %1649  ;;  %1539 = vmatprep.subr.bf16.mxu0 %v1752_v0 }
 0x3e0   : > { %v957_v29 = vmul.f32 %v1650_v28, %v1642_v5 }
 0x3e2   : > { %v958_v30 = vpack.c.bf16 %v957_v29, %v957_v29 }
 0x3e5   : > { %1528 = vmatmul.mubr.msk.bf16.vlgmr.msra.gmra.mrb[16].mxu0 %vm569_vm2, %v958_v30  ;;  %v1433_v30 = vld [vmem:[%s2142_s11] ss:$0 sm:$0xff] }
 0x3e6   : > { %1543 = vmatprep.mubr.msk.bf16.mxu0 %vm1753_vm0, %v1752_v0  ;;  %1540 = vmatpush3.bf16.msra.mxu0 %v1629_v7 }
 0x3e7   : > { %1541 = vmatprep.subr.bf16.mxu0 %v1752_v0 }
 0x483   : > { %v671_v31 = vpop.f32.mrb[4].mxu0 }
 0x484   : > { %v1493_v32 = vpop.f32.mrb[5].mxu0 }
 0x485   : > { %v674_v33 = vpop.f32.mrb[6].mxu0 }
 0x486   : > { %v1494_v34 = vpop.f32.mrb[7].mxu0 }
 0x48b   : > { %v781_v35 = vpop.f32.mrb[8].mxu0 }
 0x48c   : > { %1008 = vrot.lane.b32.xlu1 %v781_v35, %s1765_s20  ;;  %v1505_v36 = vpop.f32.mrb[9].mxu0  ;;  %s1442_s20 = sshll.u32 %s1865_s17, 7  ;;  %s1768_s17 = smov [#allocation5]  }
 0x48d   : > { %v784_v37 = vpop.f32.mrb[10].mxu0  ;;  %s2088_s0 = scalar_lea.hbm %s2145_s14, %s1442_s20 }
 0x48e   : > { %v1506_v38 = vpop.f32.mrb[11].mxu0 }
 0x4b0   : > { %v891_v41 = vpop.f32.mrb[12].mxu0 }
 0x4b1   : > { %1012 = vrot.lane.b32.xlu0 %v891_v41, %s1766_s22  ;;  %v1517_v42 = vpop.f32.mrb[13].mxu0  ;;  %s482_s22 = sand.u32 1, %s1741_s30  }
 0x4b2   : > { %v894_v43 = vpop.f32.mrb[14].mxu0  ;;  %s1306_s19 = scalar_lea.sflag [#allocation4], %s482_s22 }
 0x4b3   : > { %v1518_v44 = vpop.f32.mrb[15].mxu0 }
 0x4b8   : > { %v1001_v45 = vpop.f32.mrb[16].mxu0 }
 0x4b9   : > { %1016 = vrot.lane.b32.xlu1 %v1001_v45, %s1767_s24  ;;  %v1529_v46 = vpop.f32.mrb[17].mxu0  ;;  %s1408_s24 = sshll.u32 %s482_s22, 3 }
 0x4ba   : > { %v1004_v47 = vpop.f32.mrb[18].mxu0  ;;  %v1439_v46 = vld [vmem:[%s2143_s12] ss:$0 sm:$0xff]  ;;  %s484_s21 = scalar_lea.vmem [#allocation5], %s1408_s24  ;;  %s1687_s24 = sshll.u32 %s1768_s17, 4  ;;  %s1688_s24 = int_to_ptr.vmem [resolvable:$false] %s1687_s24 }
 0x4bb   : > { %v1530_v48 = vpop.f32.mrb[19].mxu0  ;;  %s1319_s26 = sshll.u32 %s484_s21, 4  ;;  %s1689_s27 = scalar_lea.vmem %s1688_s24, 256  ;;  %s2090_s26 = int_to_ptr.vmem [resolvable:$true] %s1319_s26 }
 0x4bc   : > { %v1440_v48 = vld [vmem:[%s2144_s13] ss:$0 sm:$0xff]  ;;  %s1683_s25 = scalar_lea.vmem %s2090_s26, 128  ;;  %p1690_p2 = scmp.lt.s32.totalorder %s2090_s26, %s1688_s24 }
 0x4bd   : > { %p1684_p5 = scmp.ne.s32.totalorder %s2090_s26, %s1683_s25  ;;  %p1691_p3 = scmp.lt.s32.totalorder %s1689_s27, %s1683_s25 }
 0x4bf   : > { %p1685_p10 = pnand %p1684_p5, %p2166_p9  ;;  %p1692_p4 = por %p1691_p3, %p1690_p2 }
 0x4c1   : > { %p1686_p12 = pneg %p1685_p10 }
 0x4c3   : > { %p1693_p7 = pnand %p1692_p4, %p1686_p12 }
 0x4fe   : > { %v1009_v49 = vpop.permute.xlu1 %1008 }
 0x4ff   : > { %v1019_v51 = vsel %vm569_vm2, %v671_v31, %v1009_v49 }
 0x523   : > { %v1013_v50 = vpop.permute.xlu0 %1012 }
 0x524   : > { %v1021_v52 = vsel %vm1020_vm4, %v1019_v51, %v1013_v50 }
 0x52b   : > { %v1017_v53 = vpop.permute.xlu1 %1016 }
 0x52c   : > { %v1023_v54 = vsel %vm1022_vm5, %v1021_v52, %v1017_v53 }
 0x52d   : > { %v1024_v55 = vpack.c.bf16 %v1023_v54, %v1023_v54 }
 0x52f   : > { %1536 = vmatmul.mubr.msk.bf16.vlgmr.msra.gmra.mrb[16].mxu1 %vm519_vm1, %v1024_v55 }
 0x530   : > { %1555 = vmatprep.mubr.msk.bf16.mxu1 %vm1753_vm0, %v1752_v0  ;;  %1548 = vmatpush3.bf16.msra.mxu1 %v1631_v8 }
 0x531   : > { %1549 = vmatprep.subr.bf16.mxu1 %v1752_v0 }
 0x534   : > { %1550 = vmatpush3.bf16.msra.mxu1 %v1632_v9 }
 0x535   : > { %1551 = vmatprep.subr.bf16.mxu1 %v1752_v0 }
 0x538   : > { %1552 = vmatpush3.bf16.msra.mxu1 %v1633_v20 }
 0x539   : > { %1553 = vmatprep.subr.bf16.mxu1 %v1752_v0 }
 0x53c   : > { %1554 = vmatpush3.bf16.msra.mxu1 %v1634_v21 }
 0x602   : > { %v1085_v57 = vpop.f32.mrb[16].mxu1 }
 0x603   : > { %v1086_v58 = vadd.f32 %v1423_v56, %v1085_v57  ;;  %v1537_v59 = vpop.f32.mrb[17].mxu1 }
 0x604   : > { %v1088_v60 = vpop.f32.mrb[18].mxu1 }
 0x605   : > { %v1538_v61 = vpop.f32.mrb[19].mxu1  ;;  %v1091_v62 = vadd.f32 %v1086_v58, %v1947_v3  ;;  %v1630_v3 = vld [vmem:[%s2139_s8 + $0x8] sm:$0xff]  }
 0x606   : > { %1542 = vmatpush3.bf16.msra.mxu0 %v1630_v3 }
 0x607   : > { %v1094_v63 = vsel %vm519_vm1, %v1091_v62, 0.0 }
 0x608   : > { %1095 = vadd.xlane.f32.xlu0 %v1094_v63 }
 0x695   : > { %v1096_v1 = vpop.xlane.xlu0 %1095 }
 0x696   : > { %v1098_v2 = vmul.f32 0.03125, %v1096_v1 }
 0x698   : > { %v1099_v4 = vsub.f32 %v1091_v62, %v1098_v2 }
 0x69a   : > { %v1100_v5 = vmul.f32 %v1099_v4, %v1099_v4 }
 0x69c   : > { %v1101_v6 = vsel %vm519_vm1, %v1100_v5, 0.0 }
 0x69d   : > { %1102 = vadd.xlane.f32.xlu1 %v1101_v6 }
 0x72a   : > { %v1103_v11 = vpop.xlane.xlu1 %1102 }
 0x72b   : > { %v1104_v12 = vmul.f32 0.03125, %v1103_v11 }
 0x72d   : > { %v1105_v13 = vadd.f32 1e-05, %v1104_v12 }
 0x72f   : > { %1651 = vrsqrt.f32 %v1105_v13 }
 0x739   : > { %v1652_v14 = vpop.eup %1651 }
 0x73a   : > { %v1107_v16 = vmul.f32 %v1652_v14, %v1099_v4 }
 0x73c   : > { %v1114_v18 = vmul.f32 %v1427_v15, %v1107_v16 }
 0x73e   : > { %v1121_v10 = vadd.f32 %v1428_v17, %v1114_v18 }
 0x740   : > { %v1122_v19 = vpack.c.bf16 %v1121_v10, %v1121_v10 }
 0x742   : > { %1544 = vmatmul.mubr.msk.bf16.vlgmr.msra.gmra.mrb[20].mxu0 %vm519_vm1, %v1122_v19 }
 0x815   : > { %v1183_v23 = vpop.f32.mrb[20].mxu0 }
 0x816   : > { %v1184_v24 = vadd.f32 %v1429_v22, %v1183_v23  ;;  %v1545_v25 = vpop.f32.mrb[21].mxu0 }
 0x817   : > { %v1186_v26 = vpop.f32.mrb[22].mxu0 }
 0x818   : > { %v1189_v27 = vmax.f32 %v1184_v24, 0.0  ;;  %v1546_v28 = vpop.f32.mrb[23].mxu0 }
 0x81a   : > { %v1190_v29 = vpack.c.bf16 %v1189_v27, %v1189_v27 }
 0x81c   : > { %1556 = vmatmul.mubr.msk.bf16.vlgmr.msra.gmra.mrb[20].mxu1 %vm1230_vm6, %v1190_v29 }
 0x8ef   : > { %v1268_v0 = vpop.f32.mrb[20].mxu1 }
 0x8f0   : > { %v1269_v31 = vadd.f32 %v1433_v30, %v1268_v0  ;;  %v1557_v32 = vpop.f32.mrb[21].mxu1 }
 0x8f1   : > { %v1271_v33 = vpop.f32.mrb[22].mxu1 }
 0x8f2   : > { %v1558_v34 = vpop.f32.mrb[23].mxu1  ;;  %v1274_v35 = vadd.f32 %v1269_v31, %v1121_v10 }
 0x8f4   : > { %v1277_v36 = vsel %vm519_vm1, %v1274_v35, 0.0 }
 0x8f5   : > { %1278 = vadd.xlane.f32.xlu0 %v1277_v36 }
 0x982   : > { %v1279_v37 = vpop.xlane.xlu0 %1278 }
 0x983   : > { %v1280_v38 = vmul.f32 0.03125, %v1279_v37 }
 0x985   : > { %v1281_v39 = vsub.f32 %v1274_v35, %v1280_v38 }
 0x987   : > { %v1282_v40 = vmul.f32 %v1281_v39, %v1281_v39 }
 0x989   : > { %v1283_v41 = vsel %vm519_vm1, %v1282_v40, 0.0 }
 0x98a   : > { %1284 = vadd.xlane.f32.xlu0 %v1283_v41 }
 0xa17   : > { %v1285_v42 = vpop.xlane.xlu0 %1284 }
 0xa18   : > { %v1286_v43 = vmul.f32 0.03125, %v1285_v42 }
 0xa1a   : > { %v1287_v44 = vadd.f32 1e-05, %v1286_v43 }
 0xa1c   : > { %1653 = vrsqrt.f32 %v1287_v44 }
 0xa26   : > { %v1654_v45 = vpop.eup %1653 }
 0xa27   : > { %v1289_v47 = vmul.f32 %v1654_v45, %v1281_v39 }
 0xa29   : > { %v1296_v49 = vmul.f32 %v1439_v46, %v1289_v47 }
 0xa2b   : > { %v1303_v50 = vadd.f32 %v1440_v48, %v1296_v49 }
 0xa2d   : > { %1304 = vst.msk [vmem:[%s484_s21] sm:$0xff] %vm519_vm1, %v1303_v50 }
 0xa2e   : > { %1696 = shalt.err (!%p1693_p7)
}
 0xa2f   : > { %s1697_s22 = scalar_lea.hbm %s2088_s0, 128  ;;  %s1701_s21 = scalar_lea.hbm %s2145_s14, 256 }
 0xa30   : > { %p1698_p8 = scmp.ne.s32.totalorder %s2088_s0, %s1697_s22  ;;  %p1702_p1 = scmp.lt.u32.totalorder %s2088_s0, %s2145_s14 }
 0xa31   : > { %p1703_p0 = scmp.lt.u32.totalorder %s1701_s21, %s1697_s22  ;;  %p1705_p5 = scmp.lt.u32.totalorder %s1697_s22, %s2088_s0 }
 0xa32   : > { %p1699_p11 = pnand %p1698_p8, %p2166_p9 }
 0xa33   : > { %p1704_p6 = por %p1703_p0, %p1702_p1 }
 0xa34   : > { %p1700_p13 = pneg %p1699_p11 }
 0xa35   : > { %p1706_p10 = por %p1705_p5, %p1704_p6 }
 0xa37   : > { %p1707_p12 = pnand %p1706_p10, %p1700_p13 }
 0xa39   : > { %1710 = shalt.err (!%p1707_p12)
}
 0xa3a   : > { %1563 = dma.vmem_to_hbm [thread:$0]  (%p2166_p9), %s2090_s26, 128, %s2088_s0, %s1306_s19  }
 0xa3b PF: > { %s2167_s25 = sld [smem:[#allocation11_spill]]  ;;  %p1575_p2 = scmp.ge.s32.totalorder %s1749_s16, 2 }
 0xa3c   : > { %s1331_s17 = sand.u32 1, %s1737_s29  }
 0xa3d   : > { %s1332_s24 = scalar_lea.sflag [#allocation4], %s1331_s17 }
 0xa41   : > { %p2168_p3 = scmp.ne.s32.totalorder %s2167_s25, 0 }
 0xa43   : > { %p1570_p4 = pnand %p1575_p2, %p2168_p3 }
 0xa45   : > { %1732 = dma.done.wait (!%p1570_p4), %s1332_s24, 128  }
 0xa46   : > { %1734 = vsyncadd (!%p1570_p4), %s1332_s24, 4294967168  ;;  %s2169_s16 = sld [smem:[#allocation9_spill]]  ;;  %s2170_s27 = sld [smem:[#allocation8_spill]] }
 0xa47   : > { %s2171_s15 = sld [smem:[#allocation10_spill]]  ;;  %s2172_s29 = smov %s1741_s30 }
 0xa4c   : > { %p25_p7 = scmp.ge.s32.totalorder %s2169_s16, 4   ;;  %s2173_s30 = smov %s2170_s27 }
 0xa4e   :  { %27 = sbr.rel (!%p25_p7) target bundleno = 6 (0x6), region = 119 }
 0xa55   :  { %1337 = vsyncpa [#allocation3], 1 }
 0xa56   :  { %1339 = vsyncpa [#allocation3 + $0x1], 1 }
 0xa57   :  { %1340 = vsyncpa [#allocation4], 1 }
 0xa58   :  { %1342 = vsyncpa [#allocation4 + $0x1], 1 }

</bundles_post_ra>
